<compile_context>
chip_gen: v6e
topology: v6e:2x2x1
jax: 0.10.0
libtpu: 0.0.40
codegen_flags: <defaults>
</compile_context>

<pallas_src>
import functools

import jax
import jax.numpy as jnp
from jax.experimental import pallas as pl
from jax.experimental.pallas import tpu as pltpu

LANE = 128


def _round_up(x, m):
    return ((x + m - 1) // m) * m


# --------------------------- stage 1: encoder + projection head ---------------------------
def _encode_kernel(x_ref, encw_ref, encb_ref, uemb_ref,
                   p1w_ref, p1b_ref, p2w_ref, p2b_ref,
                   h_ref, zproj_ref, acc_ref):
    k = pl.program_id(0)

    @pl.when(k == 0)
    def _():
        acc_ref[...] = jnp.zeros_like(acc_ref)

    # K-tile of x @ enc_w, accumulated in f32
    acc_ref[...] += jnp.dot(x_ref[...], encw_ref[...],
                            preferred_element_type=jnp.float32)

    @pl.when(k == pl.num_programs(0) - 1)
    def _():
        h = acc_ref[...] + encb_ref[...] + uemb_ref[...]
        h_ref[...] = h
        # projection head: Linear -> ReLU -> Linear (bf16 MXU, f32 accumulation)
        z1 = jnp.dot(h.astype(jnp.bfloat16), p1w_ref[...],
                     preferred_element_type=jnp.float32) + p1b_ref[...]
        z1 = jnp.maximum(z1, 0.0)
        zproj_ref[...] = (jnp.dot(z1.astype(jnp.bfloat16), p2w_ref[...],
                                  preferred_element_type=jnp.float32)
                          + p2b_ref[...])


# --------------------------- stage 2: decoder + sigmoid + BCE ---------------------------
def _decode_kernel(h_ref, decw_ref, decb_ref, tgt_ref,
                   logits_ref, loss_ref, loss_acc,
                   *, n_items, item_tile, apply_mask, inv_batch):
    j = pl.program_id(0)

    @pl.when(j == 0)
    def _():
        loss_acc[...] = jnp.zeros_like(loss_acc)

    probs = (jnp.dot(h_ref[...].astype(jnp.bfloat16), decw_ref[...],
                     preferred_element_type=jnp.float32)
             + decb_ref[...])
    logits_ref[...] = jax.nn.sigmoid(probs)

    # BCE-with-logits (softplus form): max(z,0) - t*z + log(1 + exp(-|z|))
    tgt = tgt_ref[...].astype(jnp.float32)
    bce = (jnp.maximum(probs, 0.0) - tgt * probs
           + jnp.log(1.0 + jnp.exp(-jnp.abs(probs))))
    if apply_mask:  # static: only emitted when n_items was padded up to the tile
        col = j * item_tile + jax.lax.broadcasted_iota(jnp.int32, bce.shape, 1)
        bce = jnp.where(col < n_items, bce, 0.0)

    loss_acc[...] += jnp.sum(bce)

    @pl.when(j == pl.num_programs(0) - 1)
    def _():
        loss_ref[...] = loss_acc[...] * inv_batch


def cdae_forward(x, target, user_emb_rows,
                 enc_w, enc_b, dec_w, dec_b,
                 p1_w, p1_b, p2_w, p2_b,
                 *, item_tile=1024):
    """All Linear weights are passed as [in_features, out_features] (pre-transposed)."""
    B, n_items = x.shape
    dfac = enc_w.shape[1]
    proj_hid = p2_w.shape[1]

    f32, bf16 = jnp.float32, jnp.bfloat16
    dfac_p = _round_up(dfac, LANE)          # lane-dense hidden dim
    ph_p = _round_up(proj_hid, LANE)        # lane-dense projection dim
    item_tile = _round_up(item_tile, LANE)
    tn = min(item_tile, _round_up(n_items, LANE))
    items_p = _round_up(n_items, tn)
    n_tiles = items_p // tn

    def pad_to(a, rows, cols, dtype):
        a = a.astype(dtype)
        return jnp.pad(a, ((0, rows - a.shape[0]), (0, cols - a.shape[1])))

    # zero padding is exact: padded x/target cols are 0, padded weight rows/cols are 0
    x_b = pad_to(x, B, items_p, bf16)
    tgt_b = pad_to(target, B, items_p, bf16)
    ue = pad_to(user_emb_rows, B, dfac_p, f32)
    encw = pad_to(enc_w, items_p, dfac_p, bf16)
    encb = pad_to(enc_b, 1, dfac_p, f32)
    decw = pad_to(dec_w, dfac_p, items_p, bf16)
    decb = pad_to(dec_b, 1, items_p, f32)
    p1w = pad_to(p1_w, dfac_p, ph_p, bf16)
    p1b = pad_to(p1_b, 1, ph_p, f32)
    p2w = pad_to(p2_w, ph_p, ph_p, bf16)
    p2b = pad_to(p2_b, 1, ph_p, f32)

    # ---- stage 1: h = x @ enc_w + enc_b + uemb ; z_proj = proj_head(h) (K = n_items tiled)
    h, z_proj = pl.pallas_call(
        _encode_kernel,
        out_shape=(jax.ShapeDtypeStruct((B, dfac_p), f32),
                   jax.ShapeDtypeStruct((B, ph_p), f32)),
        grid_spec=pltpu.PrefetchScalarGridSpec(
            num_scalar_prefetch=0,
            grid=(n_tiles,),
            in_specs=[
                pl.BlockSpec((B, tn), lambda k: (0, k)),          # x tile
                pl.BlockSpec((tn, dfac_p), lambda k: (k, 0)),     # enc_w tile
                pl.BlockSpec((1, dfac_p), lambda k: (0, 0)),      # enc_b (resident)
                pl.BlockSpec((B, dfac_p), lambda k: (0, 0)),      # user emb rows
                pl.BlockSpec((dfac_p, ph_p), lambda k: (0, 0)),   # p1_w
                pl.BlockSpec((1, ph_p), lambda k: (0, 0)),        # p1_b
                pl.BlockSpec((ph_p, ph_p), lambda k: (0, 0)),     # p2_w
                pl.BlockSpec((1, ph_p), lambda k: (0, 0)),        # p2_b
            ],
            out_specs=(pl.BlockSpec((B, dfac_p), lambda k: (0, 0)),
                       pl.BlockSpec((B, ph_p), lambda k: (0, 0))),
            scratch_shapes=[pltpu.VMEM((B, dfac_p), f32)],
        ),
        compiler_params=pltpu.CompilerParams(
            dimension_semantics=("arbitrary",)),   # K reduction axis
    )(x_b, encw, encb, ue, p1w, p1b, p2w, p2b)

    # ---- stage 2: probs = h @ dec_w + dec_b ; logits = sigmoid ; BCE loss (N = n_items tiled)
    decode = functools.partial(
        _decode_kernel,
        n_items=n_items, item_tile=tn,
        apply_mask=(items_p != n_items), inv_batch=1.0 / B)

    logits_p, loss = pl.pallas_call(
        decode,
        out_shape=(jax.ShapeDtypeStruct((B, items_p), f32),
                   jax.ShapeDtypeStruct((1, 1), f32)),
        grid_spec=pltpu.PrefetchScalarGridSpec(
            num_scalar_prefetch=0,
            grid=(n_tiles,),
            in_specs=[
                pl.BlockSpec((B, dfac_p), lambda j: (0, 0)),      # h (resident)
                pl.BlockSpec((dfac_p, tn), lambda j: (0, j)),     # dec_w tile
                pl.BlockSpec((1, tn), lambda j: (0, j)),          # dec_b tile
                pl.BlockSpec((B, tn), lambda j: (0, j)),          # target tile
            ],
            out_specs=(pl.BlockSpec((B, tn), lambda j: (0, j)),   # logits tile
                       pl.BlockSpec((1, 1), lambda j: (0, 0))),   # scalar loss
            scratch_shapes=[pltpu.VMEM((1, 1), f32)],
        ),
        compiler_params=pltpu.CompilerParams(
            dimension_semantics=("arbitrary",)),   # loss accumulated across tiles
    )(h, decw, decb, tgt_b)

    return logits_p[:, :n_items], loss[0, 0], z_proj[:, :proj_hid]


def init_params(key, n_users, n_items, dfac, proj_hid):
    """Deterministic synthetic parameter init (xavier-like scaling), f32 master copies."""
    ks = jax.random.split(key, 8)

    def xavier(k, fan_in, fan_out):
        limit = (6.0 / (fan_in + fan_out)) ** 0.5
        # stored as [in, out] (transposed relative to torch.nn.Linear.weight)
        return jax.random.uniform(k, (fan_in, fan_out), jnp.float32, -limit, limit)

    return dict(
        user_emb_table=jax.random.normal(ks[0], (n_users, dfac), jnp.float32) * 0.1,
        enc_w=xavier(ks[1], n_items, dfac),
        enc_b=(jax.random.normal(ks[2], (1, dfac), jnp.float32) * 0.001),
        dec_w=xavier(ks[3], dfac, n_items),
        dec_b=(jax.random.normal(ks[4], (1, n_items), jnp.float32) * 0.001),
        p1_w=xavier(ks[5], dfac, proj_hid),
        p1_b=jnp.zeros((1, proj_hid), jnp.float32),
        p2_w=xavier(ks[6], proj_hid, proj_hid),
        p2_b=jnp.zeros((1, proj_hid), jnp.float32),
    )


if __name__ == "__main__":
    # Small shapes consistent with the module. n_items=320 with item_tile=128 exercises
    # multi-tile K accumulation, multi-tile N decode, and the padded-column loss mask.
    B, n_users, n_items, dfac, proj_hid = 8, 16, 320, 64, 64

    key = jax.random.PRNGKey(0)
    k_in, k_out, k_uid, k_params = jax.random.split(key, 4)

    x = jax.random.bernoulli(k_in, 0.1, (B, n_items)).astype(jnp.float32)
    target = jax.random.bernoulli(k_out, 0.1, (B, n_items)).astype(jnp.float32)
    user_id = jax.random.randint(k_uid, (B,), 0, n_users)

    p = init_params(k_params, n_users, n_items, dfac, proj_hid)

    # Embedding lookup is a data-dependent row gather; done in plain JAX as glue.
    user_emb_rows = jnp.take(p["user_emb_table"], user_id, axis=0)  # (B, dfac)

    logits, recon_loss, z_proj = cdae_forward(
        x, target, user_emb_rows,
        p["enc_w"], p["enc_b"], p["dec_w"], p["dec_b"],
        p["p1_w"], p["p1_b"], p["p2_w"], p["p2_b"],
        item_tile=128,
    )
    jax.block_until_ready((logits, recon_loss, z_proj))

    # ---- reference in plain JAX (same bf16 MXU inputs / f32 accumulation as the kernel) ----
    bf16 = jnp.bfloat16

    def bdot(a, b):
        return jnp.dot(a.astype(bf16), b.astype(bf16),
                       preferred_element_type=jnp.float32)

    h_ref = bdot(x, p["enc_w"]) + p["enc_b"] + user_emb_rows
    probs_ref = bdot(h_ref, p["dec_w"]) + p["dec_b"]
    logits_ref = jax.nn.sigmoid(probs_ref)
    # PyTorch binary_cross_entropy clamps log terms at -100 (spec semantics)
    log_p = jnp.maximum(jnp.log(logits_ref), -100.0)
    log_1mp = jnp.maximum(jnp.log(1.0 - logits_ref), -100.0)
    loss_ref = jnp.mean(jnp.sum(-(target * log_p + (1.0 - target) * log_1mp), axis=1))
    z1_ref = jnp.maximum(bdot(h_ref, p["p1_w"]) + p["p1_b"], 0.0)
    z_ref = bdot(z1_ref, p["p2_w"]) + p["p2_b"]

    assert logits.shape == (B, n_items) and z_proj.shape == (B, proj_hid)
    assert jnp.allclose(logits, logits_ref, atol=5e-3), float(jnp.max(jnp.abs(logits - logits_ref)))
    assert jnp.allclose(recon_loss, loss_ref, rtol=5e-3, atol=5e-2), (float(recon_loss), float(loss_ref))
    assert jnp.allclose(z_proj, z_ref, atol=1e-2), float(jnp.max(jnp.abs(z_proj - z_ref)))

    print("KERNEL_OK")
</pallas_src>

<mosaic_0001>
module attributes {stable_mosaic.version = 11 : i64} {
  func.func @_encode_kernel(%arg0: i32, %arg1: memref<8x128xbf16, #tpu.memory_space<vmem>>, %arg2: memref<128x128xbf16, #tpu.memory_space<vmem>>, %arg3: memref<1x128xf32, #tpu.memory_space<vmem>>, %arg4: memref<8x128xf32, #tpu.memory_space<vmem>>, %arg5: memref<128x128xbf16, #tpu.memory_space<vmem>>, %arg6: memref<1x128xf32, #tpu.memory_space<vmem>>, %arg7: memref<128x128xbf16, #tpu.memory_space<vmem>>, %arg8: memref<1x128xf32, #tpu.memory_space<vmem>>, %arg9: memref<8x128xf32, #tpu.memory_space<vmem>>, %arg10: memref<8x128xf32, #tpu.memory_space<vmem>>, %arg11: memref<8x128xf32, #tpu.memory_space<vmem>>) attributes {dimension_semantics = [#tpu.dimension_semantics<arbitrary>], iteration_bounds = array<i64: 3>, scalar_prefetch = 0 : i64, scratch_operands = 1 : i64, tpu.core_type = #tpu.core_type<tc>, window_params = [{transform_indices = @transform_0, window_bounds = array<i64: 8, 128>}, {transform_indices = @transform_1, window_bounds = array<i64: 128, 128>}, {pipeline_mode = #tpu.pipeline_mode<synchronous>, transform_indices = @transform_2, window_bounds = array<i64: 1, 128>}, {pipeline_mode = #tpu.pipeline_mode<synchronous>, transform_indices = @transform_3, window_bounds = array<i64: 8, 128>}, {pipeline_mode = #tpu.pipeline_mode<synchronous>, transform_indices = @transform_4, window_bounds = array<i64: 128, 128>}, {pipeline_mode = #tpu.pipeline_mode<synchronous>, transform_indices = @transform_5, window_bounds = array<i64: 1, 128>}, {pipeline_mode = #tpu.pipeline_mode<synchronous>, transform_indices = @transform_6, window_bounds = array<i64: 128, 128>}, {pipeline_mode = #tpu.pipeline_mode<synchronous>, transform_indices = @transform_7, window_bounds = array<i64: 1, 128>}, {pipeline_mode = #tpu.pipeline_mode<synchronous>, transform_indices = @transform_8, window_bounds = array<i64: 8, 128>}, {pipeline_mode = #tpu.pipeline_mode<synchronous>, transform_indices = @transform_9, window_bounds = array<i64: 8, 128>}]} {
    %c0_i32 = arith.constant 0 : i32
    %0 = arith.cmpi eq, %arg0, %c0_i32 : i32
    %1 = arith.extui %0 : i1 to i32
    %c0_i32_0 = arith.constant 0 : i32
    %2 = arith.cmpi ne, %1, %c0_i32_0 : i32
    scf.if %2 {
      %cst_9 = arith.constant 0.000000e+00 : f32
      %12 = vector.broadcast %cst_9 : f32 to vector<8x128xf32>
      %c0_10 = arith.constant 0 : index
      %c0_11 = arith.constant 0 : index
      %13 = vector.load %arg11[%c0_10, %c0_11] : memref<8x128xf32, #tpu.memory_space<vmem>>, vector<8x128xf32>
      tpu.vector_store %arg11[%c0_10, %c0_11], %12 {strides = array<i32>} : memref<8x128xf32, #tpu.memory_space<vmem>>, vector<8x128xf32>,
    } else {
    }
    %c0 = arith.constant 0 : index
    %c0_1 = arith.constant 0 : index
    %3 = vector.load %arg11[%c0, %c0_1] : memref<8x128xf32, #tpu.memory_space<vmem>>, vector<8x128xf32>
    %c0_2 = arith.constant 0 : index
    %c0_3 = arith.constant 0 : index
    %4 = vector.load %arg1[%c0_2, %c0_3] : memref<8x128xbf16, #tpu.memory_space<vmem>>, vector<8x128xbf16>
    %c0_4 = arith.constant 0 : index
    %c0_5 = arith.constant 0 : index
    %5 = vector.load %arg2[%c0_4, %c0_5] : memref<128x128xbf16, #tpu.memory_space<vmem>>, vector<128x128xbf16>
    %cst = arith.constant dense<0.000000e+00> : vector<8x128xf32>
    %6 = tpu.matmul %4, %5, %cst {dimension_numbers = #tpu.dot_dimension_numbers<[1], [0], [0], [1], [0, 0, 1, 1], [], []>} : vector<8x128xbf16>, vector<128x128xbf16>, vector<8x128xf32> -> vector<8x128xf32>
    %7 = arith.addf %3, %6 : vector<8x128xf32>
    %c0_6 = arith.constant 0 : index
    %c0_7 = arith.constant 0 : index
    %8 = vector.load %arg11[%c0_6, %c0_7] : memref<8x128xf32, #tpu.memory_space<vmem>>, vector<8x128xf32>
    tpu.vector_store %arg11[%c0_6, %c0_7], %7 {strides = array<i32>} : memref<8x128xf32, #tpu.memory_space<vmem>>, vector<8x128xf32>,
    %c2_i32 = arith.constant 2 : i32
    %9 = arith.cmpi eq, %arg0, %c2_i32 : i32
    %10 = arith.extui %9 : i1 to i32
    %c0_i32_8 = arith.constant 0 : i32
    %11 = arith.cmpi ne, %10, %c0_i32_8 : i32
    scf.if %11 {
      %c0_9 = arith.constant 0 : index
      %c0_10 = arith.constant 0 : index
      %12 = vector.load %arg11[%c0_9, %c0_10] : memref<8x128xf32, #tpu.memory_space<vmem>>, vector<8x128xf32>
      %c0_11 = arith.constant 0 : index
      %c0_12 = arith.constant 0 : index
      %13 = vector.load %arg3[%c0_11, %c0_12] : memref<1x128xf32, #tpu.memory_space<vmem>>, vector<1x128xf32>
      %14 = vector.broadcast %13 : vector<1x128xf32> to vector<8x128xf32>
      %15 = arith.addf %12, %14 : vector<8x128xf32>
      %c0_13 = arith.constant 0 : index
      %c0_14 = arith.constant 0 : index
      %16 = vector.load %arg4[%c0_13, %c0_14] : memref<8x128xf32, #tpu.memory_space<vmem>>, vector<8x128xf32>
      %17 = arith.addf %15, %16 : vector<8x128xf32>
      %c0_15 = arith.constant 0 : index
      %c0_16 = arith.constant 0 : index
      %18 = vector.load %arg9[%c0_15, %c0_16] : memref<8x128xf32, #tpu.memory_space<vmem>>, vector<8x128xf32>
      tpu.vector_store %arg9[%c0_15, %c0_16], %17 {strides = array<i32>} : memref<8x128xf32, #tpu.memory_space<vmem>>, vector<8x128xf32>,
      %19 = arith.truncf %17 : vector<8x128xf32> to vector<8x128xbf16>
      %c0_17 = arith.constant 0 : index
      %c0_18 = arith.constant 0 : index
      %20 = vector.load %arg5[%c0_17, %c0_18] : memref<128x128xbf16, #tpu.memory_space<vmem>>, vector<128x128xbf16>
      %cst_19 = arith.constant dense<0.000000e+00> : vector<8x128xf32>
      %21 = tpu.matmul %19, %20, %cst_19 {dimension_numbers = #tpu.dot_dimension_numbers<[1], [0], [0], [1], [0, 0, 1, 1], [], []>} : vector<8x128xbf16>, vector<128x128xbf16>, vector<8x128xf32> -> vector<8x128xf32>
      %c0_20 = arith.constant 0 : index
      %c0_21 = arith.constant 0 : index
      %22 = vector.load %arg6[%c0_20, %c0_21] : memref<1x128xf32, #tpu.memory_space<vmem>>, vector<1x128xf32>
      %23 = vector.broadcast %22 : vector<1x128xf32> to vector<8x128xf32>
      %24 = arith.addf %21, %23 : vector<8x128xf32>
      %cst_22 = arith.constant 0.000000e+00 : f32
      %25 = vector.broadcast %cst_22 : f32 to vector<8x128xf32>
      %26 = arith.maximumf %24, %25 : vector<8x128xf32>
      %27 = arith.truncf %26 : vector<8x128xf32> to vector<8x128xbf16>
      %c0_23 = arith.constant 0 : index
      %c0_24 = arith.constant 0 : index
      %28 = vector.load %arg7[%c0_23, %c0_24] : memref<128x128xbf16, #tpu.memory_space<vmem>>, vector<128x128xbf16>
      %cst_25 = arith.constant dense<0.000000e+00> : vector<8x128xf32>
      %29 = tpu.matmul %27, %28, %cst_25 {dimension_numbers = #tpu.dot_dimension_numbers<[1], [0], [0], [1], [0, 0, 1, 1], [], []>} : vector<8x128xbf16>, vector<128x128xbf16>, vector<8x128xf32> -> vector<8x128xf32>
      %c0_26 = arith.constant 0 : index
      %c0_27 = arith.constant 0 : index
      %30 = vector.load %arg8[%c0_26, %c0_27] : memref<1x128xf32, #tpu.memory_space<vmem>>, vector<1x128xf32>
      %31 = vector.broadcast %30 : vector<1x128xf32> to vector<8x128xf32>
      %32 = arith.addf %29, %31 : vector<8x128xf32>
      %c0_28 = arith.constant 0 : index
      %c0_29 = arith.constant 0 : index
      %33 = vector.load %arg10[%c0_28, %c0_29] : memref<8x128xf32, #tpu.memory_space<vmem>>, vector<8x128xf32>
      tpu.vector_store %arg10[%c0_28, %c0_29], %32 {strides = array<i32>} : memref<8x128xf32, #tpu.memory_space<vmem>>, vector<8x128xf32>,
    } else {
    }
    return
  }
  func.func @transform_0(%arg0: i32) -> (i32, i32) {
    %c0_i32 = arith.constant 0 : i32
    %c0_i32_0 = arith.constant 0 : i32
    return %c0_i32, %arg0 : i32, i32
  }
  func.func @transform_1(%arg0: i32) -> (i32, i32) {
    %c0_i32 = arith.constant 0 : i32
    %c0_i32_0 = arith.constant 0 : i32
    return %arg0, %c0_i32 : i32, i32
  }
  func.func @transform_2(%arg0: i32) -> (i32, i32) {
    %c0_i32 = arith.constant 0 : i32
    %c0_i32_0 = arith.constant 0 : i32
    %c0_i32_1 = arith.constant 0 : i32
    return %c0_i32, %c0_i32_0 : i32, i32
  }
  func.func @transform_3(%arg0: i32) -> (i32, i32) {
    %c0_i32 = arith.constant 0 : i32
    %c0_i32_0 = arith.constant 0 : i32
    %c0_i32_1 = arith.constant 0 : i32
    return %c0_i32, %c0_i32_0 : i32, i32
  }
  func.func @transform_4(%arg0: i32) -> (i32, i32) {
    %c0_i32 = arith.constant 0 : i32
    %c0_i32_0 = arith.constant 0 : i32
    %c0_i32_1 = arith.constant 0 : i32
    return %c0_i32, %c0_i32_0 : i32, i32
  }
  func.func @transform_5(%arg0: i32) -> (i32, i32) {
    %c0_i32 = arith.constant 0 : i32
    %c0_i32_0 = arith.constant 0 : i32
    %c0_i32_1 = arith.constant 0 : i32
    return %c0_i32, %c0_i32_0 : i32, i32
  }
  func.func @transform_6(%arg0: i32) -> (i32, i32) {
    %c0_i32 = arith.constant 0 : i32
    %c0_i32_0 = arith.constant 0 : i32
    %c0_i32_1 = arith.constant 0 : i32
    return %c0_i32, %c0_i32_0 : i32, i32
  }
  func.func @transform_7(%arg0: i32) -> (i32, i32) {
    %c0_i32 = arith.constant 0 : i32
    %c0_i32_0 = arith.constant 0 : i32
    %c0_i32_1 = arith.constant 0 : i32
    return %c0_i32, %c0_i32_0 : i32, i32
  }
  func.func @transform_8(%arg0: i32) -> (i32, i32) {
    %c0_i32 = arith.constant 0 : i32
    %c0_i32_0 = arith.constant 0 : i32
    %c0_i32_1 = arith.constant 0 : i32
    return %c0_i32, %c0_i32_0 : i32, i32
  }
  func.func @transform_9(%arg0: i32) -> (i32, i32) {
    %c0_i32 = arith.constant 0 : i32
    %c0_i32_0 = arith.constant 0 : i32
    %c0_i32_1 = arith.constant 0 : i32
    return %c0_i32, %c0_i32_0 : i32, i32
  }
}

</mosaic_0001>

<bundles_post_ra>
// kernel: tpu_custom_call.1
= control target key start
LH: loop header
LB: loop body
LE: loop exit
PB: predicated region body
PF: predicated region fallthrough
CT: control target
= control target key end

     0   :  { %s1715_s0 = inlined_call_operand.hbm [shape: bf16[8,384], index: 0, kind: input, shape index: {}]   ;;  %s1716_s1 = inlined_call_operand.hbm [shape: bf16[384,128], index: 1, kind: input, shape index: {}]   ;;  %s1717_s2 = inlined_call_operand.vmem [shape: f32[1,128], index: 2, kind: input, shape index: {}]   ;;  %s1718_s3 = inlined_call_operand.hbm [shape: f32[8,128], index: 3, kind: input, shape index: {}]   ;;  %s1719_s4 = inlined_call_operand.hbm [shape: bf16[128,128], index: 4, kind: input, shape index: {}]   ;;  %s1720_s5 = inlined_call_operand.vmem [shape: f32[1,128], index: 5, kind: input, shape index: {}]   ;;  %s1721_s6 = inlined_call_operand.hbm [shape: bf16[128,128], index: 6, kind: input, shape index: {}]   ;;  %s1722_s7 = inlined_call_operand.vmem [shape: f32[1,128], index: 7, kind: input, shape index: {}]   ;;  %s1723_s8 = inlined_call_operand.hbm [shape: f32[8,128], index: 8, kind: output, shape index: {0}]   ;;  %s1724_s9 = inlined_call_operand.hbm [shape: f32[8,128], index: 9, kind: output, shape index: {1}]  }
   0x1   :  { %1730 = sst [smem:[#allocation21_spill]] %s1715_s0 }
   0x2   :  { %1731 = sst [smem:[#allocation22_spill]] %s1718_s3 }
   0x3   :  { %15 = vsyncpa [#allocation4], 0 }
   0x4   :  { %17 = vsyncpa [#allocation4 + $0x1], 0 }
   0x5   :  { %18 = vsyncpa [#allocation7], 0 }
   0x6   :  { %20 = vsyncpa [#allocation7 + $0x1], 0 }
   0x7   :  { %21 = vsyncpa [#allocation10], 0 }
   0x8   :  { %22 = vsyncpa [#allocation5], 0 }
   0x9   :  { %23 = vsyncpa [#allocation14], 0  ;;  %s1465_s30 = smov 0   ;;  %s1467_s10 = smov 0  }
   0xa   :  { %s1469_s11 = smov 0   ;;  %s1471_s12 = smov 0  }
   0xb LB: > { %s1484_s13 = sadd.s32 4294967295, %s1399_s12   ;;  %p49_p0 = scmp.ne.s32.totalorder %s1391_s10, %s1387_s30  ;;  %s1399_s12 = sphi %s1471_s12, %s1752_s12   ;;  %s1395_s11 = sphi %s1469_s11, %s1751_s11   ;;  %s1391_s10 = sphi %s1467_s10, %s1750_s10   ;;  %s1387_s30 = sphi %s1465_s30, %s1749_s30  }
   0xc   : > { %p1725_p1 = scmp.eq.s32.totalorder %s1484_s13, 0  ;;  %p904_p2 = scmp.ge.s32.totalorder %s1399_s12, 1 }
   0xd   : > { %p254_p3 = scmp.lt.s32.totalorder %s1399_s12, 4  ;;  %s1401_s16 = smov [#allocation8]  }
   0xe   : > { %p1493_p5 = por %p1725_p1, %p49_p0  ;;  %s270_s17 = sshll.u32 %s1401_s16, 4  ;;  %s271_s17 = int_to_ptr.vmem [resolvable:$true] %s270_s17 }
   0xf   : > { %p1497_p6 = pnand %p904_p2, %p254_p3  ;;  %s1402_s18 = smov [#allocation9]  }
  0x10   : > { %s1732_s14 = scalar_select %p1493_p5, 1, 0 }
  0x11   : > { %s1733_s15 = scalar_select %p1497_p6, 1, 0 }
  0x12   : > { %p1067_p7 = pneg %p1497_p6  ;;  %s280_s19 = sshll.u32 %s1402_s18, 4  ;;  %s281_s19 = int_to_ptr.vmem [resolvable:$true] %s280_s19 }
  0x13   : > { %s1403_s21 = smov [#allocation11]   ;;  %s1174_s23 = scalar_lea.vmem %s271_s17, 128 }
  0x14   : > { %p1505_p8 = pnand %p1067_p7, %p1725_p1  ;;  %s296_s22 = sshll.u32 %s1403_s21, 4  ;;  %s297_s22 = int_to_ptr.vmem [resolvable:$true] %s296_s22 }
  0x15   : > { %p1175_p10 = scmp.ne.s32.totalorder %s271_s17, %s1174_s23  ;;  %p1182_p13 = scmp.lt.s32.totalorder %s271_s17, %s271_s17 }
  0x16   : > { %p1165_p9 = pneg %p1505_p8  ;;  %p1183_p0 = scmp.lt.s32.totalorder %s1174_s23, %s1174_s23 }
  0x18   : > { %p1177_p11 = pnand %p1175_p10, %p1165_p9  ;;  %p1184_p2 = por %p1183_p0, %p1182_p13 }
  0x1a   : > { %p1178_p12 = pneg %p1177_p11 }
  0x1c   : > { %p1185_p3 = pnand %p1184_p2, %p1178_p12 }
  0x1e   : > { %1188 = shalt.err (!%p1185_p3)
}
  0x1f   : > { %s1735_s3 = sld [smem:[#allocation22_spill]]  ;;  %s1200_s26 = scalar_lea.vmem %s281_s19, 1024 }
  0x20   : > { %p1201_p7 = scmp.ne.s32.totalorder %s281_s19, %s1200_s26  ;;  %p1208_p10 = scmp.lt.s32.totalorder %s281_s19, %s281_s19 }
  0x21   : > { %p1209_p11 = scmp.lt.s32.totalorder %s1200_s26, %s1200_s26 }
  0x22   : > { %p1203_p4 = pnand %p1201_p7, %p1165_p9 }
  0x23   : > { %p1210_p5 = por %p1209_p11, %p1208_p10 }
  0x24   : > { %p1204_p1 = pneg %p1203_p4 }
  0x25   : > { %1070 = dma.hbm_to_vmem [thread:$0]  (!%p1505_p8), %s1735_s3, 128, %s271_s17, [#allocation7]  }
  0x26   : > { %p1211_p6 = pnand %p1210_p5, %p1204_p1 }
  0x28   : > { %1214 = shalt.err (!%p1211_p6)
}
  0x29   : > { %s1728_s27 = smov 64   ;;  %s1729_s28 = smov 4  }
  0x2a   : > { %1073 = dma.hbm_to_vmem [thread:$0]  (!%p1505_p8), %s1719_s4, 1024, %s281_s19, [#allocation10], %s1728_s27, %s1728_s27, %s1729_s28  }
  0x2b   : > { %s1226_s16 = scalar_lea.vmem %s297_s22, 1024  ;;  %p1234_p5 = scmp.lt.s32.totalorder %s297_s22, %s297_s22 }
  0x2c   : > { %p1227_p4 = scmp.ne.s32.totalorder %s297_s22, %s1226_s16  ;;  %p1235_p6 = scmp.lt.s32.totalorder %s1226_s16, %s1226_s16 }
  0x2e   : > { %p1229_p12 = pnand %p1227_p4, %p1165_p9  ;;  %p1236_p13 = por %p1235_p6, %p1234_p5 }
  0x30   : > { %p1230_p1 = pneg %p1229_p12 }
  0x32   : > { %p1237_p0 = pnand %p1236_p13, %p1230_p1 }
  0x34   : > { %1240 = shalt.err (!%p1237_p0)
}
  0x35   : > { %1076 = dma.hbm_to_vmem [thread:$0]  (!%p1505_p8), %s1721_s6, 1024, %s297_s22, [#allocation10], %s1728_s27, %s1728_s27, %s1729_s28  }
  0x36   : > { %s1542_s19 = sadd.s32 1, %s1399_s12   ;;  %s36_s21 = sadd.s32 1, %s1395_s11 }
  0x37   : > { %s33_s20 = ssub.s32 %s1399_s12, %s1542_s19  ;;  %p43_p2 = scmp.ne.s32.totalorder %s1395_s11, %s1391_s10 }
  0x38   : > { %p34_p9 = scmp.eq.s32.totalorder %s33_s20, 0  ;;  %p44_p3 = scmp.eq.s32.totalorder %s1399_s12, 0 }
  0x39   : > { %p1087_p7 = scmp.lt.s32.totalorder %s1399_s12, 3  ;;  %s1555_s24 = sand.u32 1, %s1395_s11  }
  0x3a   : > { %s1552_s23 = scalar_select %p34_p9, %s1395_s11, %s36_s21  }
  0x3b   : > { %p45_p10 = por %p44_p3, %p43_p2  ;;  %s909_s25 = sshll.u32 %s1555_s24, 2 }
  0x3c   : > { %s910_s22 = sshll.u32 %s1399_s12, 6  ;;  %s1736_s0 = sld [smem:[#allocation21_spill]] }
  0x3d   : > { %s317_s16 = scalar_lea.vmem [#allocation3], %s909_s25  ;;  %p1566_p8 = pnand %p1087_p7, %p45_p10 }
  0x3e   : > { %s324_s17 = sshll.u32 %s317_s16, 4  ;;  %s314_s27 = scalar_lea.sflag [#allocation4], %s1555_s24  ;;  %s1564_s17 = int_to_ptr.vmem [resolvable:$true] %s324_s17 }
  0x3f   : > { %p1243_p4 = pneg %p1566_p8 }
  0x42   : > { %s1562_s30 = scalar_lea.hbm %s1736_s0, %s910_s22  ;;  %s1246_s26 = scalar_lea.hbm %s1736_s0, 192 }
  0x43   : > { %s1241_s28 = scalar_lea.hbm %s1562_s30, 64  ;;  %p1247_p5 = scmp.lt.s32.totalorder %s1562_s30, %s1736_s0 }
  0x44   : > { %p1242_p11 = scmp.ne.s32.totalorder %s1562_s30, %s1241_s28  ;;  %p1248_p6 = scmp.lt.s32.totalorder %s1246_s26, %s1241_s28 }
  0x46   : > { %p1244_p12 = pnand %p1243_p4, %p1242_p11  ;;  %p1249_p13 = por %p1248_p6, %p1247_p5 }
  0x48   : > { %p1245_p1 = pneg %p1244_p12 }
  0x4a   : > { %p1250_p0 = pnand %p1249_p13, %p1245_p1 }
  0x4c   : > { %1253 = shalt.err (!%p1250_p0)
}
  0x4d   : > { %s1254_s21 = scalar_lea.vmem %s1564_s17, 64  ;;  %s1406_s25 = smov [#allocation3]  }
  0x4e   : > { %p1255_p9 = scmp.ne.s32.totalorder %s1564_s17, %s1254_s21  ;;  %s1259_s22 = sshll.u32 %s1406_s25, 4  ;;  %s1260_s22 = int_to_ptr.vmem [resolvable:$false] %s1259_s22 }
  0x4f   : > { %s1261_s20 = scalar_lea.vmem %s1260_s22, 128  ;;  %p1262_p7 = scmp.lt.s32.totalorder %s1564_s17, %s1260_s22 }
  0x50   : > { %p1257_p2 = pnand %p1255_p9, %p1243_p4  ;;  %p1263_p10 = scmp.lt.s32.totalorder %s1261_s20, %s1254_s21 }
  0x52   : > { %p1258_p3 = pneg %p1257_p2  ;;  %p1264_p11 = por %p1263_p10, %p1262_p7 }
  0x54   : > { %p1265_p12 = pnand %p1264_p11, %p1258_p3 }
  0x56   : > { %1268 = shalt.err (!%p1265_p12)
}
  0x57   : > { %1080 = dma.hbm_to_vmem [thread:$0]  (!%p1566_p8), %s1562_s30, 64, %s1564_s17, %s314_s27  }
  0x58   : > { %s1738_s28 = sshll.u32 %s1555_s24, 6  ;;  %s955_s16 = sshll.u32 %s1399_s12, 10 }
  0x59   : > { %s335_s26 = scalar_lea.vmem [#allocation6], %s1738_s28  ;;  %s1605_s21 = scalar_lea.hbm %s1716_s1, %s955_s16 }
  0x5a   : > { %s342_s29 = sshll.u32 %s335_s26, 4  ;;  %s1739_s22 = sand.u32 1, %s1399_s12   ;;  %s1599_s29 = int_to_ptr.vmem [resolvable:$true] %s342_s29 }
  0x5b   : > { %s332_s0 = scalar_lea.sflag [#allocation7], %s1739_s22  ;;  %s1269_s3 = scalar_lea.hbm %s1605_s21, 1024 }
  0x5c   : > { %p1270_p1 = scmp.ne.s32.totalorder %s1605_s21, %s1269_s3  ;;  %s1274_s30 = scalar_lea.hbm %s1716_s1, 3072 }
  0x5d   : > { %p1275_p13 = scmp.lt.s32.totalorder %s1605_s21, %s1716_s1  ;;  %p1276_p0 = scmp.lt.s32.totalorder %s1274_s30, %s1269_s3 }
  0x5e   : > { %p1272_p5 = pnand %p1270_p1, %p1243_p4 }
  0x5f   : > { %p1277_p9 = por %p1276_p0, %p1275_p13 }
  0x60   : > { %p1273_p6 = pneg %p1272_p5 }
  0x62   : > { %p1278_p2 = pnand %p1277_p9, %p1273_p6 }
  0x64   : > { %1281 = shalt.err (!%p1278_p2)
}
  0x65   : > { %s1282_s12 = scalar_lea.vmem %s1599_s29, 1024  ;;  %s1407_s26 = smov [#allocation6]  }
  0x66   : > { %p1283_p3 = scmp.ne.s32.totalorder %s1599_s29, %s1282_s12  ;;  %s1287_s16 = sshll.u32 %s1407_s26, 4  ;;  %s1288_s16 = int_to_ptr.vmem [resolvable:$false] %s1287_s16 }
  0x67   : > { %s1289_s25 = scalar_lea.vmem %s1288_s16, 2048  ;;  %p1290_p11 = scmp.lt.s32.totalorder %s1599_s29, %s1288_s16 }
  0x68   : > { %p1285_p7 = pnand %p1283_p3, %p1243_p4  ;;  %p1291_p12 = scmp.lt.s32.totalorder %s1289_s25, %s1282_s12 }
  0x6a   : > { %p1286_p10 = pneg %p1285_p7  ;;  %p1292_p1 = por %p1291_p12, %p1290_p11 }
  0x6c   : > { %p1293_p5 = pnand %p1292_p1, %p1286_p10 }
  0x6e   : > { %1296 = shalt.err (!%p1293_p5)
}
  0x6f   : > { %s1740_s3 = smov 4   ;;  %s1741_s20 = smov 64  }
  0x70   : > { %1083 = dma.hbm_to_vmem [thread:$0]  (!%p1566_p8), %s1605_s21, 1024, %s1599_s29, %s332_s0, %s1741_s20, %s1741_s20, %s1740_s3  }
  0x71   : > { %p1742_p4 = scmp.ne.s32.totalorder %s1733_s15, 0 }
  0x72   : > { %s356_s22 = sand.u32 (!%p1742_p4), 1, %s1391_s10   ;;  %p1743_p6 = scmp.ne.s32.totalorder (!%p1742_p4), %s1732_s14, 0 }
  0x73   : > { %354 = sbr.rel (%p1742_p4) target bundleno = 830 (0x33e), region = 52  ;;  %s915_s27 = sshll.u32 (!%p1742_p4), %s356_s22, 2 }
  0x74   : > { %s357_s24 = scalar_lea.sflag (!%p1742_p4), [#allocation4], %s356_s22  ;;  %s1637_s30 = scalar_lea.vmem (!%p1742_p4), [#allocation3], %s915_s27 }
  0x78   : > { %1362 = dma.done.wait (%p1743_p6), %s357_s24, 64  }
  0x79   : > { %1364 = vsyncadd (%p1743_p6), %s357_s24, 4294967232  ;;  %s365_s18 = sand.u32 1, %s1484_s13   ;;  %s916_s17 = sshll.u32 %s356_s22, 6 }
  0x7a   : > { %s366_s0 = scalar_lea.sflag [#allocation7], %s365_s18  ;;  %s1644_s29 = scalar_lea.vmem [#allocation6], %s916_s17 }
  0x7b   : > { %1366 = dma.done.wait (%p1743_p6), %s366_s0, 1024  }
  0x7c   : > { %1368 = vsyncadd (%p1743_p6), %s366_s0, 4294966272  ;;  %p1744_p8 = scmp.eq.s32.totalorder %s1484_s13, 0 }
  0x7e   : > { %1370 = dma.done.wait (%p1744_p8), [#allocation7], 128   ;;  %p1745_p13 = pmov %p1744_p8 }
  0x7f   : > { %p1746_p0 = pmov %p1744_p8 }
  0x80   : > { %1372 = vsyncadd (%p1745_p13), [#allocation7], 4294967168 }
  0x81   : > { %1374 = dma.done.wait (%p1746_p0), [#allocation10], 2048   ;;  %p1747_p9 = pmov %p1746_p0 }
  0x82   : > { %p1748_p2 = scmp.ne.s32.totalorder %s1484_s13, 0 }
  0x83   : > { %1376 = vsyncadd (%p1747_p9), [#allocation10], 4294965248 }
  0x84   : > { %421 = sbr.rel (%p1748_p2) target bundleno = 139 (0x8b), region = 76 }
  0x89   : > { %v1408_v0 = vmov 0.0  }
  0x8a   : > { %422 = vst [vmem:[#allocation2] sm:$0xff] %v1408_v0 }
  0x8b PF: > { %v1139_v1 = vld [vmem:[%s1644_s29 + $0x38] sm:$0xff]   ;;  %v1409_v2 = vmov 0.0   ;;  %v1140_v3 = vld [vmem:[%s1644_s29 + $0x30] sm:$0xff]   ;;  %vm1410_vm0 = vmmov 0   ;;  %v1141_v4 = vld [vmem:[%s1644_s29 + $0x28] sm:$0xff]   ;;  %p929_p3 = scmp.ne.s32.totalorder %s1484_s13, 2 }
  0x8c   : > { %983 = vmatprep.subr.bf16.mxu0 %v1409_v2  ;;  %999 = vmatprep.mubr.msk.bf16.mxu0 %vm1410_vm0, %v1409_v2  ;;  %v1142_v5 = vld [vmem:[%s1644_s29 + $0x20] sm:$0xff]   ;;  %v1143_v6 = vld [vmem:[%s1644_s29 + $0x18] sm:$0xff]   ;;  %v1144_v7 = vld [vmem:[%s1644_s29 + $0x10] sm:$0xff]  }
  0x8d   : > { %984 = vmatpush3.bf16.msra.mxu0 %v1139_v1  ;;  %v1145_v8 = vld [vmem:[%s1644_s29 + $0x8] sm:$0xff]   ;;  %v1146_v9 = vld [vmem:[%s1644_s29] sm:$0xff]   ;;  %v424_v10 = vld [vmem:[%s1637_s30] sm:$0xf] }
  0x8e   : > { %985 = vmatprep.subr.bf16.mxu0 %v1409_v2 }
  0x91   : > { %986 = vmatpush3.bf16.msra.mxu0 %v1140_v3  ;;  %v423_v11 = vld [vmem:[#allocation2] sm:$0xff] }
  0x92   : > { %987 = vmatprep.subr.bf16.mxu0 %v1409_v2 }
  0x95   : > { %988 = vmatpush3.bf16.msra.mxu0 %v1141_v4 }
  0x96   : > { %989 = vmatprep.subr.bf16.mxu0 %v1409_v2 }
  0x99   : > { %990 = vmatpush3.bf16.msra.mxu0 %v1142_v5 }
  0x9a   : > { %991 = vmatprep.subr.bf16.mxu0 %v1409_v2 }
  0x9d   : > { %992 = vmatpush3.bf16.msra.mxu0 %v1143_v6 }
  0x9e   : > { %993 = vmatprep.subr.bf16.mxu0 %v1409_v2 }
  0xa1   : > { %994 = vmatpush3.bf16.msra.mxu0 %v1144_v7 }
  0xa2   : > { %995 = vmatprep.subr.bf16.mxu0 %v1409_v2 }
  0xa5   : > { %996 = vmatpush3.bf16.msra.mxu0 %v1145_v8 }
  0xa6   : > { %997 = vmatprep.subr.bf16.mxu0 %v1409_v2 }
  0xa9   : > { %998 = vmatpush3.bf16.msra.mxu0 %v1146_v9 }
  0xac   : > { %1000 = vmatmul.mubr.bf16.vlgmr.msra.gmra.mxu0 %v424_v10 }
 0x16c   : > { %v523_v12 = vpop.f32.mrf.mxu0 }
 0x16d   : > { %v529_v13 = vadd.f32 %v523_v12, %v423_v11 }
 0x16e   : > { %v1001_v14 = vpop.f32.mrf.mxu0  ;;  %534 = sbr.rel (%p929_p3) target bundleno = 802 (0x322), region = 80 }
 0x16f   : > { %530 = vst [vmem:[#allocation2] sm:$0xff] %v529_v13 }
 0x170   : > { %v526_v15 = vpop.f32.mrf.mxu0 }
 0x172   : > { %v1002_v16 = vpop.f32.mrf.mxu0 }
 0x173   : > { %v1147_v17 = vld [vmem:[#allocation9 + $0x38] sm:$0xff]   ;;  %v1411_v18 = vmov 0.0   ;;  %v1148_v19 = vld [vmem:[#allocation9 + $0x30] sm:$0xff]   ;;  %vm1412_vm1 = vmmov 0   ;;  %v1149_v20 = vld [vmem:[#allocation9 + $0x28] sm:$0xff]  }
 0x174   : > { %1003 = vmatprep.subr.bf16.mxu0 %v1411_v18  ;;  %1023 = vmatprep.subr.bf16.mxu1 %v1411_v18  ;;  %v930_v22 = vld [vmem:[%s1717_s2] ss:$0 sm:$0xff]  ;;  %v544_v23 = vld [vmem:[#allocation8] sm:$0xff]  ;;  %v1150_v26 = vld [vmem:[#allocation9 + $0x20] sm:$0xff]  }
 0x175   : > { %1004 = vmatpush3.bf16.msra.mxu0 %v1147_v17  ;;  %1019 = vmatprep.mubr.msk.bf16.mxu0 %vm1412_vm1, %v1411_v18  ;;  %v1155_v25 = vld [vmem:[#allocation11 + $0x38] sm:$0xff]   ;;  %v1156_v28 = vld [vmem:[#allocation11 + $0x30] sm:$0xff]   ;;  %v1157_v30 = vld [vmem:[#allocation11 + $0x28] sm:$0xff]  }
 0x176   : > { %1005 = vmatprep.subr.bf16.mxu0 %v1411_v18  ;;  %1039 = vmatprep.mubr.msk.bf16.mxu1 %vm1412_vm1, %v1411_v18  ;;  %v535_v21 = vld [vmem:[#allocation2] sm:$0xff]  ;;  %v1151_v29 = vld [vmem:[#allocation9 + $0x18] sm:$0xff]   ;;  %v1152_v31 = vld [vmem:[#allocation9 + $0x10] sm:$0xff]  }
 0x177   : > { %v543_v24 = vadd.f32 %v930_v22, %v535_v21  ;;  %1024 = vmatpush3.bf16.msra.mxu1 %v1155_v25  ;;  %v1158_v32 = vld [vmem:[#allocation11 + $0x20] sm:$0xff]   ;;  %v1153_v33 = vld [vmem:[#allocation9 + $0x8] sm:$0xff]   ;;  %v1159_v34 = vld [vmem:[#allocation11 + $0x18] sm:$0xff]  }
 0x178   : > { %1025 = vmatprep.subr.bf16.mxu1 %v1411_v18  ;;  %v1154_v35 = vld [vmem:[#allocation9] sm:$0xff]   ;;  %v1160_v36 = vld [vmem:[#allocation11 + $0x10] sm:$0xff]   ;;  %v1161_v38 = vld [vmem:[#allocation11 + $0x8] sm:$0xff]  }
 0x179   : > { %1006 = vmatpush3.bf16.msra.mxu0 %v1148_v19  ;;  %v545_v27 = vadd.f32 %v544_v23, %v543_v24  ;;  %v1162_v39 = vld [vmem:[#allocation11] sm:$0xff]   ;;  %v931_v40 = vld [vmem:[%s1720_s5] ss:$0 sm:$0xff] }
 0x17a   : > { %1007 = vmatprep.subr.bf16.mxu0 %v1411_v18  ;;  %v940_v48 = vld [vmem:[%s1722_s7] ss:$0 sm:$0xff] }
 0x17b   : > { %546 = vst [vmem:[#allocation12] sm:$0xff] %v545_v27  ;;  %1026 = vmatpush3.bf16.msra.mxu1 %v1156_v28  ;;  %v547_v37 = vpack.c.bf16 %v545_v27, %v545_v27 }
 0x17c   : > { %1027 = vmatprep.subr.bf16.mxu1 %v1411_v18 }
 0x17d   : > { %1008 = vmatpush3.bf16.msra.mxu0 %v1149_v20 }
 0x17e   : > { %1009 = vmatprep.subr.bf16.mxu0 %v1411_v18 }
 0x17f   : > { %1028 = vmatpush3.bf16.msra.mxu1 %v1157_v30 }
 0x180   : > { %1029 = vmatprep.subr.bf16.mxu1 %v1411_v18 }
 0x181   : > { %1010 = vmatpush3.bf16.msra.mxu0 %v1150_v26 }
 0x182   : > { %1011 = vmatprep.subr.bf16.mxu0 %v1411_v18 }
 0x183   : > { %1030 = vmatpush3.bf16.msra.mxu1 %v1158_v32 }
 0x184   : > { %1031 = vmatprep.subr.bf16.mxu1 %v1411_v18 }
 0x185   : > { %1012 = vmatpush3.bf16.msra.mxu0 %v1151_v29 }
 0x186   : > { %1013 = vmatprep.subr.bf16.mxu0 %v1411_v18 }
 0x187   : > { %1032 = vmatpush3.bf16.msra.mxu1 %v1159_v34 }
 0x188   : > { %1033 = vmatprep.subr.bf16.mxu1 %v1411_v18 }
 0x189   : > { %1014 = vmatpush3.bf16.msra.mxu0 %v1152_v31 }
 0x18a   : > { %1015 = vmatprep.subr.bf16.mxu0 %v1411_v18 }
 0x18b   : > { %1034 = vmatpush3.bf16.msra.mxu1 %v1160_v36 }
 0x18c   : > { %1035 = vmatprep.subr.bf16.mxu1 %v1411_v18 }
 0x18d   : > { %1016 = vmatpush3.bf16.msra.mxu0 %v1153_v33 }
 0x18e   : > { %1017 = vmatprep.subr.bf16.mxu0 %v1411_v18 }
 0x18f   : > { %1036 = vmatpush3.bf16.msra.mxu1 %v1161_v38 }
 0x190   : > { %1037 = vmatprep.subr.bf16.mxu1 %v1411_v18 }
 0x191   : > { %1018 = vmatpush3.bf16.msra.mxu0 %v1154_v35 }
 0x193   : > { %1038 = vmatpush3.bf16.msra.mxu1 %v1162_v39 }
 0x194   : > { %1020 = vmatmul.mubr.bf16.vlgmr.msra.gmra.mxu0 %v547_v37 }
 0x254   : > { %v653_v41 = vpop.f32.mrf.mxu0 }
 0x255   : > { %v654_v42 = vadd.f32 %v931_v40, %v653_v41 }
 0x256   : > { %v1021_v43 = vpop.f32.mrf.mxu0 }
 0x257   : > { %v659_v44 = vmax.f32 %v654_v42, 0.0 }
 0x258   : > { %v656_v45 = vpop.f32.mrf.mxu0 }
 0x259   : > { %v660_v46 = vpack.c.bf16 %v659_v44, %v659_v44 }
 0x25a   : > { %v1022_v47 = vpop.f32.mrf.mxu0 }
 0x25b   : > { %1040 = vmatmul.mubr.bf16.vlgmr.msra.gmra.mxu1 %v660_v46 }
 0x31b   : > { %v766_v49 = vpop.f32.mrf.mxu1 }
 0x31c   : > { %v767_v50 = vadd.f32 %v940_v48, %v766_v49 }
 0x31d   : > { %v1041_v51 = vpop.f32.mrf.mxu1 }
 0x31e   : > { %772 = vst [vmem:[#allocation13] sm:$0xff] %v767_v50 }
 0x31f   : > { %v769_v52 = vpop.f32.mrf.mxu1 }
 0x321   : > { %v1042_v53 = vpop.f32.mrf.mxu1 }
 0x322 PF: > { %p1091_p7 = scmp.eq.s32.totalorder %s1484_s13, 2  ;;  %s1413_s16 = smov [#allocation12]  }
 0x323   : > { %s780_s25 = sshll.u32 %s1413_s16, 4  ;;  %s1414_s3 = smov [#allocation13]   ;;  %s781_s25 = int_to_ptr.vmem [resolvable:$true] %s780_s25 }
 0x324   : > { %s791_s20 = sshll.u32 %s1414_s3, 4  ;;  %s1297_s22 = scalar_lea.vmem %s781_s25, 128  ;;  %s792_s20 = int_to_ptr.vmem [resolvable:$true] %s791_s20 }
 0x325   : > { %p1298_p10 = scmp.ne.s32.totalorder %s781_s25, %s1297_s22  ;;  %p1304_p1 = scmp.lt.s32.totalorder %s781_s25, %s781_s25 }
 0x326   : > { %p1305_p5 = scmp.lt.s32.totalorder %s1297_s22, %s1297_s22 }
 0x327   : > { %p1299_p11 = pnand %p1298_p10, %p1091_p7 }
 0x328   : > { %p1306_p4 = por %p1305_p5, %p1304_p1 }
 0x329   : > { %p1300_p12 = pneg %p1299_p11 }
 0x32b   : > { %p1307_p6 = pnand %p1306_p4, %p1300_p12 }
 0x32d   : > { %1310 = shalt.err (!%p1307_p6)
}
 0x32e   : > { %1060 = dma.vmem_to_hbm [thread:$0]  (%p1091_p7), %s781_s25, 128, %s1723_s8, [#allocation5]  }
 0x32f   : > { %s1321_s30 = scalar_lea.vmem %s792_s20, 128  ;;  %p1328_p9 = scmp.lt.s32.totalorder %s792_s20, %s792_s20 }
 0x330   : > { %p1322_p8 = scmp.ne.s32.totalorder %s792_s20, %s1321_s30  ;;  %p1329_p2 = scmp.lt.s32.totalorder %s1321_s30, %s1321_s30 }
 0x332   : > { %p1323_p13 = pnand %p1322_p8, %p1091_p7  ;;  %p1330_p3 = por %p1329_p2, %p1328_p9 }
 0x334   : > { %p1324_p0 = pneg %p1323_p13 }
 0x336   : > { %p1331_p10 = pnand %p1330_p3, %p1324_p0 }
 0x338   : > { %1334 = shalt.err (!%p1331_p10)
}
 0x339   : > { %1062 = dma.vmem_to_hbm [thread:$0]  (%p1091_p7), %s792_s20, 128, %s1724_s9, [#allocation14]  }
 0x33a   : > { %1378 = dma.done.wait (%p1091_p7), [#allocation5], 128  }
 0x33b   : > { %1380 = vsyncadd (%p1091_p7), [#allocation5], 4294967168 }
 0x33c   : > { %1382 = dma.done.wait (%p1091_p7), [#allocation14], 128  }
 0x33d   : > { %1384 = vsyncadd (%p1091_p7), [#allocation14], 4294967168 }
 0x33e PF: > { %p26_p11 = scmp.ge.s32.totalorder %s1542_s19, 5   ;;  %s1749_s30 = smov %s1391_s10 }
 0x33f   : > { %s1750_s10 = smov %s1395_s11  ;;  %s1751_s11 = smov %s1552_s23 }
 0x340   : > { %s1752_s12 = smov %s1542_s19  ;;  %28 = sbr.rel (!%p26_p11) target bundleno = 11 (0xb), region = 130 }
 0x345   :  { %808 = vsyncpa [#allocation4], 1 }
 0x346   :  { %810 = vsyncpa [#allocation4 + $0x1], 1 }
 0x347   :  { %811 = vsyncpa [#allocation7], 1 }
 0x348   :  { %813 = vsyncpa [#allocation7 + $0x1], 1 }
 0x349   :  { %814 = vsyncpa [#allocation10], 1 }
 0x34a   :  { %815 = vsyncpa [#allocation5], 1 }
 0x34b   :  { %817 = vsyncpa [#allocation5 + $0x1], 1 }
 0x34c   :  { %818 = vsyncpa [#allocation14], 1 }

</bundles_post_ra>
